<compile_context>
chip_gen: v5e
topology: v5e:2x2
jax: 0.10.0
libtpu: 0.0.40
codegen_flags: <defaults>
</compile_context>

<pallas_src>
import jax
import jax.numpy as jnp
from jax.experimental import pallas as pl
from jax.experimental.pallas import tpu as pltpu


NEG_SLOPE = 0.2

# Real hidden sizes and their lane-aligned padded sizes.
H1, H2, H3 = 500, 100, 50
H1P, H2P, H3P = 512, 128, 128


def _leaky(x):
    # 0 < slope < 1 so max(x, slope*x) == leaky_relu(x); 2 VALU ops/elem.
    return jnp.maximum(x, NEG_SLOPE * x)


def _round_up(x, m):
    return ((x + m - 1) // m) * m


def _tpu_kind():
    try:
        return jax.devices()[0].device_kind.lower()
    except Exception:
        return ""


# -----------------------------------------------------------------------------
# Kernel
# -----------------------------------------------------------------------------
def make_critic_kernel(bf16_elementwise):
    """Build the kernel body; elementwise dtype is bf16 on v6e/v7x, f32 on v5e."""
    edtype = jnp.bfloat16 if bf16_elementwise else jnp.float32

    def kernel(obs_ref, act_ref,
               w1_ref, b1_ref, w2_ref, b2_ref,
               w3_ref, b3_ref, w4_ref, b4_ref,
               w5_ref, b5_ref, out_ref):
        obs = obs_ref[...].astype(jnp.bfloat16)        # (TM, K1)
        act = act_ref[...].astype(jnp.bfloat16)        # (TM, K2)

        # First layer: two small-K MXU dots (separate obs / act inputs avoid a
        # wrapper-side concat HBM pass); f32 accumulation, then elementwise in
        # edtype.
        z1 = jnp.dot(obs, w1_ref[...], preferred_element_type=jnp.float32)
        z2 = jnp.dot(act, w2_ref[...], preferred_element_type=jnp.float32)
        lat1 = _leaky(z1.astype(edtype) + b1_ref[...].astype(edtype))
        lat2 = _leaky(z2.astype(edtype) + b2_ref[...].astype(edtype))
        h = _leaky(lat1 + lat2)                        # (TM, H1P)

        z3 = jnp.dot(h.astype(jnp.bfloat16), w3_ref[...],
                     preferred_element_type=jnp.float32)
        h = _leaky(z3.astype(edtype) + b3_ref[...].astype(edtype))   # (TM, H2P)

        z4 = jnp.dot(h.astype(jnp.bfloat16), w4_ref[...],
                     preferred_element_type=jnp.float32)
        h = _leaky(z4.astype(edtype) + b4_ref[...].astype(edtype))   # (TM, H3P)

        # Final 50->1 layer on the MXU (W5 lives in column 0 of a (H3P, 128)
        # zero-padded matrix); only lane 0 of the result is meaningful.
        z5 = jnp.dot(h.astype(jnp.bfloat16), w5_ref[...],
                     preferred_element_type=jnp.float32)              # (TM, 128)
        out_ref[...] = (z5[:, 0:1] + b5_ref[...]).astype(out_ref.dtype)

    return kernel


# -----------------------------------------------------------------------------
# Parameter packing (once, outside the kernel)
# -----------------------------------------------------------------------------
def pack_params(params):
    """Zero-pad to lane-aligned widths and cast weights to bf16.

    Zero padding propagates exact zeros through bias-add and LeakyReLU, so the
    padded lanes never contaminate the real outputs.  Biases stay f32; the
    kernel casts them to its elementwise dtype (tiny, per-tile).
    """
    (w1, b1), (w2, b2), (w3, b3), (w4, b4), (w5, b5) = params
    k1, k2 = w1.shape[0], w2.shape[0]

    w1p = jnp.zeros((k1, H1P), jnp.float32).at[:, :H1].set(w1).astype(jnp.bfloat16)
    b1p = jnp.zeros((1, H1P), jnp.float32).at[:, :H1].set(b1)
    w2p = jnp.zeros((k2, H1P), jnp.float32).at[:, :H1].set(w2).astype(jnp.bfloat16)
    b2p = jnp.zeros((1, H1P), jnp.float32).at[:, :H1].set(b2)
    w3p = jnp.zeros((H1P, H2P), jnp.float32).at[:H1, :H2].set(w3).astype(jnp.bfloat16)
    b3p = jnp.zeros((1, H2P), jnp.float32).at[:, :H2].set(b3)
    w4p = jnp.zeros((H2P, H3P), jnp.float32).at[:H2, :H3].set(w4).astype(jnp.bfloat16)
    b4p = jnp.zeros((1, H3P), jnp.float32).at[:, :H3].set(b4)
    # (50, 1) weight packed into column 0 of a (H3P, 128) MXU-friendly matrix.
    w5p = jnp.zeros((H3P, 128), jnp.float32).at[:H3, 0:1].set(w5).astype(jnp.bfloat16)
    b5p = b5.reshape(1, 1).astype(jnp.float32)

    return (w1p, b1p, w2p, b2p, w3p, b3p, w4p, b4p, w5p, b5p)


# -----------------------------------------------------------------------------
# Wrapper
# -----------------------------------------------------------------------------
def critic_forward(obs, act, packed, *, tm=None, bf16_elementwise=None):
    """obs: (B, obs_space, buffer_length), act: (B, action_space) -> (B, 1)."""
    B = obs.shape[0]
    obs_flat = obs.reshape(B, -1)        # Flatten (layout-only, no HBM pass)
    k1 = obs_flat.shape[1]
    k2 = act.shape[1]

    kind = _tpu_kind()
    is_v7 = "v7" in kind
    if bf16_elementwise is None:
        bf16_elementwise = ("v6" in kind) or is_v7   # v5e VPU has no bf16

    if tm is None:
        tm = 1024
        if (not is_v7) and B >= 4096:
            tm = 2048                    # 128 MiB physical VMEM on v5e/v6e
    if is_v7 and B > 16:
        # 2 TensorCores: make sure the "parallel" grid has >= 2 steps.
        tm = min(tm, max(8, _round_up(pl.cdiv(B, 2), 8)))
    tm = max(8, min(tm, _round_up(B, 8)))

    grid = (pl.cdiv(B, tm),)             # partial last block masked by Pallas

    def resident(p):
        nd = p.ndim
        return pl.BlockSpec(p.shape, lambda i, _nd=nd: (0,) * _nd)

    in_specs = [pl.BlockSpec((tm, k1), lambda i: (i, 0)),
                pl.BlockSpec((tm, k2), lambda i: (i, 0))]
    in_specs += [resident(p) for p in packed]
    out_spec = pl.BlockSpec((tm, 1), lambda i: (i, 0))

    # v5e's scoped-VMEM default is only 16 MiB; raise it explicitly.  Keep
    # headroom on v7x (64 MiB physical per TensorCore).
    vmem_limit = (48 << 20) if is_v7 else (64 << 20)

    out = pl.pallas_call(
        make_critic_kernel(bf16_elementwise),
        out_shape=jax.ShapeDtypeStruct((B, 1), jnp.float32),
        grid_spec=pltpu.PrefetchScalarGridSpec(
            num_scalar_prefetch=0,
            grid=grid,
            in_specs=in_specs,
            out_specs=out_spec,
        ),
        compiler_params=pltpu.CompilerParams(
            dimension_semantics=("parallel",),
            vmem_limit_bytes=vmem_limit),
    )(obs_flat, act, *packed)
    return out


# -----------------------------------------------------------------------------
# Init + references
# -----------------------------------------------------------------------------
def init_params(key, observation_space, action_space, buffer_length):
    """Orthogonal weights, PyTorch-style uniform biases.  Stored as (in, out)."""
    ortho = jax.nn.initializers.orthogonal()
    dims = [
        (observation_space * buffer_length, 500),  # lin_cri1
        (action_space, 500),                       # lin_cri2
        (500, 100),                                # lin_cri3
        (100, 50),                                 # lin_cri4
        (50, 1),                                   # lin_cri5
    ]
    params = []
    for (fan_in, fan_out) in dims:
        key, kw, kb = jax.random.split(key, 3)
        w = ortho(kw, (fan_out, fan_in), jnp.float32).T      # (in, out)
        bound = 1.0 / jnp.sqrt(fan_in)
        b = jax.random.uniform(kb, (1, fan_out), jnp.float32, -bound, bound)
        params.append((w, b))
    return params


def critic_ref_kernel_numerics(obs, act, params, bf16_elementwise):
    """Pure-JAX reference matching the kernel's numerics (bf16 MXU inputs, f32
    accumulation, edtype elementwise)."""
    (w1, b1), (w2, b2), (w3, b3), (w4, b4), (w5, b5) = params
    edtype = jnp.bfloat16 if bf16_elementwise else jnp.float32

    def dot(a, w):
        return jnp.dot(a.astype(jnp.bfloat16), w.astype(jnp.bfloat16),
                       preferred_element_type=jnp.float32)

    x = obs.reshape(obs.shape[0], -1)
    lat1 = _leaky(dot(x, w1).astype(edtype) + b1.astype(edtype))
    lat2 = _leaky(dot(act, w2).astype(edtype) + b2.astype(edtype))
    h = _leaky(lat1 + lat2)
    h = _leaky(dot(h, w3).astype(edtype) + b3.astype(edtype))
    h = _leaky(dot(h, w4).astype(edtype) + b4.astype(edtype))
    return dot(h, w5) + b5


def critic_ref_f32(obs, act, params):
    """Full-precision reference (semantics check; bf16 kernel differs ~1e-2)."""
    (w1, b1), (w2, b2), (w3, b3), (w4, b4), (w5, b5) = params
    x = obs.reshape(obs.shape[0], -1)
    lat1 = _leaky(x @ w1 + b1)
    lat2 = _leaky(act @ w2 + b2)
    h = _leaky(lat1 + lat2)
    h = _leaky(h @ w3 + b3)
    h = _leaky(h @ w4 + b4)
    return h @ w5 + b5


if __name__ == "__main__":
    observation_space = 4
    buffer_length = 8
    action_space = 4

    key = jax.random.PRNGKey(0)
    kp, ko, ka, ko2, ka2 = jax.random.split(key, 5)

    params = init_params(kp, observation_space, action_space, buffer_length)
    packed = pack_params(params)

    kind = _tpu_kind()
    bf16_ew = ("v6" in kind) or ("v7" in kind)

    # Small batch -> single tile.
    B = 8
    obs = jax.random.normal(ko, (B, observation_space, buffer_length), jnp.float32)
    act = jax.random.normal(ka, (B, action_space), jnp.float32)
    out = jax.block_until_ready(critic_forward(obs, act, packed))
    ref = critic_ref_kernel_numerics(obs, act, params, bf16_ew)
    assert out.shape == (B, 1)
    assert jnp.allclose(out, ref, atol=2e-2, rtol=2e-2), (out, ref)

    # Larger, non-multiple batch with a small tile -> exercises the batch grid
    # and the masked partial last block (no wrapper-side padding).
    B2 = 100
    obs2 = jax.random.normal(ko2, (B2, observation_space, buffer_length), jnp.float32)
    act2 = jax.random.normal(ka2, (B2, action_space), jnp.float32)
    out2 = jax.block_until_ready(critic_forward(obs2, act2, packed, tm=16))
    ref2 = critic_ref_kernel_numerics(obs2, act2, params, bf16_ew)
    assert out2.shape == (B2, 1)
    assert jnp.allclose(out2, ref2, atol=2e-2, rtol=2e-2), (out2, ref2)

    print("KERNEL_OK")
</pallas_src>

<mosaic_0001>
module attributes {stable_mosaic.version = 11 : i64} {
  func.func @kernel(%arg0: i32, %arg1: memref<8x32xf32, #tpu.memory_space<vmem>>, %arg2: memref<8x4xf32, #tpu.memory_space<vmem>>, %arg3: memref<32x512xbf16, #tpu.memory_space<vmem>>, %arg4: memref<1x512xf32, #tpu.memory_space<vmem>>, %arg5: memref<4x512xbf16, #tpu.memory_space<vmem>>, %arg6: memref<1x512xf32, #tpu.memory_space<vmem>>, %arg7: memref<512x128xbf16, #tpu.memory_space<vmem>>, %arg8: memref<1x128xf32, #tpu.memory_space<vmem>>, %arg9: memref<128x128xbf16, #tpu.memory_space<vmem>>, %arg10: memref<1x128xf32, #tpu.memory_space<vmem>>, %arg11: memref<128x128xbf16, #tpu.memory_space<vmem>>, %arg12: memref<1x1xf32, #tpu.memory_space<vmem>>, %arg13: memref<8x1xf32, #tpu.memory_space<vmem>>) attributes {dimension_semantics = [#tpu.dimension_semantics<parallel>], iteration_bounds = array<i64: 1>, scalar_prefetch = 0 : i64, scratch_operands = 0 : i64, tpu.core_type = #tpu.core_type<tc>, window_params = [{transform_indices = @transform_0, window_bounds = array<i64: 8, 32>}, {transform_indices = @transform_1, window_bounds = array<i64: 8, 4>}, {pipeline_mode = #tpu.pipeline_mode<synchronous>, transform_indices = @transform_2, window_bounds = array<i64: 32, 512>}, {pipeline_mode = #tpu.pipeline_mode<synchronous>, transform_indices = @transform_3, window_bounds = array<i64: 1, 512>}, {pipeline_mode = #tpu.pipeline_mode<synchronous>, transform_indices = @transform_4, window_bounds = array<i64: 4, 512>}, {pipeline_mode = #tpu.pipeline_mode<synchronous>, transform_indices = @transform_5, window_bounds = array<i64: 1, 512>}, {pipeline_mode = #tpu.pipeline_mode<synchronous>, transform_indices = @transform_6, window_bounds = array<i64: 512, 128>}, {pipeline_mode = #tpu.pipeline_mode<synchronous>, transform_indices = @transform_7, window_bounds = array<i64: 1, 128>}, {pipeline_mode = #tpu.pipeline_mode<synchronous>, transform_indices = @transform_8, window_bounds = array<i64: 128, 128>}, {pipeline_mode = #tpu.pipeline_mode<synchronous>, transform_indices = @transform_9, window_bounds = array<i64: 1, 128>}, {pipeline_mode = #tpu.pipeline_mode<synchronous>, transform_indices = @transform_10, window_bounds = array<i64: 128, 128>}, {pipeline_mode = #tpu.pipeline_mode<synchronous>, transform_indices = @transform_11, window_bounds = array<i64: 1, 1>}, {transform_indices = @transform_12, window_bounds = array<i64: 8, 1>}]} {
    %c0 = arith.constant 0 : index
    %c0_0 = arith.constant 0 : index
    %0 = vector.load %arg1[%c0, %c0_0] : memref<8x32xf32, #tpu.memory_space<vmem>>, vector<8x32xf32>
    %1 = arith.truncf %0 : vector<8x32xf32> to vector<8x32xbf16>
    %c0_1 = arith.constant 0 : index
    %c0_2 = arith.constant 0 : index
    %2 = vector.load %arg2[%c0_1, %c0_2] : memref<8x4xf32, #tpu.memory_space<vmem>>, vector<8x4xf32>
    %3 = arith.truncf %2 : vector<8x4xf32> to vector<8x4xbf16>
    %c0_3 = arith.constant 0 : index
    %c0_4 = arith.constant 0 : index
    %4 = vector.load %arg3[%c0_3, %c0_4] : memref<32x512xbf16, #tpu.memory_space<vmem>>, vector<32x512xbf16>
    %cst = arith.constant dense<0.000000e+00> : vector<8x512xf32>
    %5 = tpu.matmul %1, %4, %cst {dimension_numbers = #tpu.dot_dimension_numbers<[1], [0], [0], [1], [0, 0, 1, 1], [], []>} : vector<8x32xbf16>, vector<32x512xbf16>, vector<8x512xf32> -> vector<8x512xf32>
    %c0_5 = arith.constant 0 : index
    %c0_6 = arith.constant 0 : index
    %6 = vector.load %arg5[%c0_5, %c0_6] : memref<4x512xbf16, #tpu.memory_space<vmem>>, vector<4x512xbf16>
    %cst_7 = arith.constant dense<0.000000e+00> : vector<8x512xf32>
    %7 = tpu.matmul %3, %6, %cst_7 {dimension_numbers = #tpu.dot_dimension_numbers<[1], [0], [0], [1], [0, 0, 1, 1], [], []>} : vector<8x4xbf16>, vector<4x512xbf16>, vector<8x512xf32> -> vector<8x512xf32>
    %c0_8 = arith.constant 0 : index
    %c0_9 = arith.constant 0 : index
    %8 = vector.load %arg4[%c0_8, %c0_9] : memref<1x512xf32, #tpu.memory_space<vmem>>, vector<1x512xf32>
    %9 = vector.broadcast %8 : vector<1x512xf32> to vector<8x512xf32>
    %10 = arith.addf %5, %9 : vector<8x512xf32>
    %cst_10 = arith.constant 2.000000e-01 : f32
    %11 = vector.broadcast %cst_10 : f32 to vector<8x512xf32>
    %12 = arith.mulf %11, %10 : vector<8x512xf32>
    %13 = arith.maximumf %10, %12 : vector<8x512xf32>
    %c0_11 = arith.constant 0 : index
    %c0_12 = arith.constant 0 : index
    %14 = vector.load %arg6[%c0_11, %c0_12] : memref<1x512xf32, #tpu.memory_space<vmem>>, vector<1x512xf32>
    %15 = vector.broadcast %14 : vector<1x512xf32> to vector<8x512xf32>
    %16 = arith.addf %7, %15 : vector<8x512xf32>
    %cst_13 = arith.constant 2.000000e-01 : f32
    %17 = vector.broadcast %cst_13 : f32 to vector<8x512xf32>
    %18 = arith.mulf %17, %16 : vector<8x512xf32>
    %19 = arith.maximumf %16, %18 : vector<8x512xf32>
    %20 = arith.addf %13, %19 : vector<8x512xf32>
    %cst_14 = arith.constant 2.000000e-01 : f32
    %21 = vector.broadcast %cst_14 : f32 to vector<8x512xf32>
    %22 = arith.mulf %21, %20 : vector<8x512xf32>
    %23 = arith.maximumf %20, %22 : vector<8x512xf32>
    %24 = arith.truncf %23 : vector<8x512xf32> to vector<8x512xbf16>
    %c0_15 = arith.constant 0 : index
    %c0_16 = arith.constant 0 : index
    %25 = vector.load %arg7[%c0_15, %c0_16] : memref<512x128xbf16, #tpu.memory_space<vmem>>, vector<512x128xbf16>
    %cst_17 = arith.constant dense<0.000000e+00> : vector<8x128xf32>
    %26 = tpu.matmul %24, %25, %cst_17 {dimension_numbers = #tpu.dot_dimension_numbers<[1], [0], [0], [1], [0, 0, 1, 1], [], []>} : vector<8x512xbf16>, vector<512x128xbf16>, vector<8x128xf32> -> vector<8x128xf32>
    %c0_18 = arith.constant 0 : index
    %c0_19 = arith.constant 0 : index
    %27 = vector.load %arg8[%c0_18, %c0_19] : memref<1x128xf32, #tpu.memory_space<vmem>>, vector<1x128xf32>
    %28 = vector.broadcast %27 : vector<1x128xf32> to vector<8x128xf32>
    %29 = arith.addf %26, %28 : vector<8x128xf32>
    %cst_20 = arith.constant 2.000000e-01 : f32
    %30 = vector.broadcast %cst_20 : f32 to vector<8x128xf32>
    %31 = arith.mulf %30, %29 : vector<8x128xf32>
    %32 = arith.maximumf %29, %31 : vector<8x128xf32>
    %33 = arith.truncf %32 : vector<8x128xf32> to vector<8x128xbf16>
    %c0_21 = arith.constant 0 : index
    %c0_22 = arith.constant 0 : index
    %34 = vector.load %arg9[%c0_21, %c0_22] : memref<128x128xbf16, #tpu.memory_space<vmem>>, vector<128x128xbf16>
    %cst_23 = arith.constant dense<0.000000e+00> : vector<8x128xf32>
    %35 = tpu.matmul %33, %34, %cst_23 {dimension_numbers = #tpu.dot_dimension_numbers<[1], [0], [0], [1], [0, 0, 1, 1], [], []>} : vector<8x128xbf16>, vector<128x128xbf16>, vector<8x128xf32> -> vector<8x128xf32>
    %c0_24 = arith.constant 0 : index
    %c0_25 = arith.constant 0 : index
    %36 = vector.load %arg10[%c0_24, %c0_25] : memref<1x128xf32, #tpu.memory_space<vmem>>, vector<1x128xf32>
    %37 = vector.broadcast %36 : vector<1x128xf32> to vector<8x128xf32>
    %38 = arith.addf %35, %37 : vector<8x128xf32>
    %cst_26 = arith.constant 2.000000e-01 : f32
    %39 = vector.broadcast %cst_26 : f32 to vector<8x128xf32>
    %40 = arith.mulf %39, %38 : vector<8x128xf32>
    %41 = arith.maximumf %38, %40 : vector<8x128xf32>
    %42 = arith.truncf %41 : vector<8x128xf32> to vector<8x128xbf16>
    %c0_27 = arith.constant 0 : index
    %c0_28 = arith.constant 0 : index
    %43 = vector.load %arg11[%c0_27, %c0_28] : memref<128x128xbf16, #tpu.memory_space<vmem>>, vector<128x128xbf16>
    %cst_29 = arith.constant dense<0.000000e+00> : vector<8x128xf32>
    %44 = tpu.matmul %42, %43, %cst_29 {dimension_numbers = #tpu.dot_dimension_numbers<[1], [0], [0], [1], [0, 0, 1, 1], [], []>} : vector<8x128xbf16>, vector<128x128xbf16>, vector<8x128xf32> -> vector<8x128xf32>
    %45 = vector.extract_strided_slice %44 {offsets = [0, 0], sizes = [8, 1], strides = [1, 1]} : vector<8x128xf32> to vector<8x1xf32>
    %c0_30 = arith.constant 0 : index
    %c0_31 = arith.constant 0 : index
    %46 = vector.load %arg12[%c0_30, %c0_31] : memref<1x1xf32, #tpu.memory_space<vmem>>, vector<1x1xf32>
    %47 = vector.broadcast %46 : vector<1x1xf32> to vector<8x1xf32>
    %48 = arith.addf %45, %47 : vector<8x1xf32>
    %c0_32 = arith.constant 0 : index
    %c0_33 = arith.constant 0 : index
    %49 = vector.load %arg13[%c0_32, %c0_33] : memref<8x1xf32, #tpu.memory_space<vmem>>, vector<8x1xf32>
    tpu.vector_store %arg13[%c0_32, %c0_33], %48 {strides = array<i32>} : memref<8x1xf32, #tpu.memory_space<vmem>>, vector<8x1xf32>,
    return
  }
  func.func @transform_0(%arg0: i32) -> (i32, i32) {
    %c0_i32 = arith.constant 0 : i32
    %c0_i32_0 = arith.constant 0 : i32
    return %arg0, %c0_i32 : i32, i32
  }
  func.func @transform_1(%arg0: i32) -> (i32, i32) {
    %c0_i32 = arith.constant 0 : i32
    %c0_i32_0 = arith.constant 0 : i32
    return %arg0, %c0_i32 : i32, i32
  }
  func.func @transform_2(%arg0: i32) -> (i32, i32) {
    %c0_i32 = arith.constant 0 : i32
    %c0_i32_0 = arith.constant 0 : i32
    %c0_i32_1 = arith.constant 0 : i32
    return %c0_i32, %c0_i32_0 : i32, i32
  }
  func.func @transform_3(%arg0: i32) -> (i32, i32) {
    %c0_i32 = arith.constant 0 : i32
    %c0_i32_0 = arith.constant 0 : i32
    %c0_i32_1 = arith.constant 0 : i32
    return %c0_i32, %c0_i32_0 : i32, i32
  }
  func.func @transform_4(%arg0: i32) -> (i32, i32) {
    %c0_i32 = arith.constant 0 : i32
    %c0_i32_0 = arith.constant 0 : i32
    %c0_i32_1 = arith.constant 0 : i32
    return %c0_i32, %c0_i32_0 : i32, i32
  }
  func.func @transform_5(%arg0: i32) -> (i32, i32) {
    %c0_i32 = arith.constant 0 : i32
    %c0_i32_0 = arith.constant 0 : i32
    %c0_i32_1 = arith.constant 0 : i32
    return %c0_i32, %c0_i32_0 : i32, i32
  }
  func.func @transform_6(%arg0: i32) -> (i32, i32) {
    %c0_i32 = arith.constant 0 : i32
    %c0_i32_0 = arith.constant 0 : i32
    %c0_i32_1 = arith.constant 0 : i32
    return %c0_i32, %c0_i32_0 : i32, i32
  }
  func.func @transform_7(%arg0: i32) -> (i32, i32) {
    %c0_i32 = arith.constant 0 : i32
    %c0_i32_0 = arith.constant 0 : i32
    %c0_i32_1 = arith.constant 0 : i32
    return %c0_i32, %c0_i32_0 : i32, i32
  }
  func.func @transform_8(%arg0: i32) -> (i32, i32) {
    %c0_i32 = arith.constant 0 : i32
    %c0_i32_0 = arith.constant 0 : i32
    %c0_i32_1 = arith.constant 0 : i32
    return %c0_i32, %c0_i32_0 : i32, i32
  }
  func.func @transform_9(%arg0: i32) -> (i32, i32) {
    %c0_i32 = arith.constant 0 : i32
    %c0_i32_0 = arith.constant 0 : i32
    %c0_i32_1 = arith.constant 0 : i32
    return %c0_i32, %c0_i32_0 : i32, i32
  }
  func.func @transform_10(%arg0: i32) -> (i32, i32) {
    %c0_i32 = arith.constant 0 : i32
    %c0_i32_0 = arith.constant 0 : i32
    %c0_i32_1 = arith.constant 0 : i32
    return %c0_i32, %c0_i32_0 : i32, i32
  }
  func.func @transform_11(%arg0: i32) -> (i32, i32) {
    %c0_i32 = arith.constant 0 : i32
    %c0_i32_0 = arith.constant 0 : i32
    %c0_i32_1 = arith.constant 0 : i32
    return %c0_i32, %c0_i32_0 : i32, i32
  }
  func.func @transform_12(%arg0: i32) -> (i32, i32) {
    %c0_i32 = arith.constant 0 : i32
    %c0_i32_0 = arith.constant 0 : i32
    return %arg0, %c0_i32 : i32, i32
  }
}

</mosaic_0001>

<bundles_post_ra>
// kernel: tpu_custom_call.1
= control target key start
LH: loop header
LB: loop body
LE: loop exit
PB: predicated region body
PF: predicated region fallthrough
CT: control target
= control target key end

     0   :  { %s1457_s0 = inlined_call_operand.vmem [shape: f32[8,32], index: 0, kind: input, shape index: {}]   ;;  %s1458_s1 = inlined_call_operand.vmem [shape: f32[8,4], index: 1, kind: input, shape index: {}]   ;;  %s1459_s2 = inlined_call_operand.hbm [shape: bf16[32,512], index: 2, kind: input, shape index: {}]   ;;  %s1460_s3 = inlined_call_operand.hbm [shape: f32[1,512], index: 3, kind: input, shape index: {}]   ;;  %s1461_s4 = inlined_call_operand.vmem [shape: bf16[4,512], index: 4, kind: input, shape index: {}]   ;;  %s1462_s5 = inlined_call_operand.hbm [shape: f32[1,512], index: 5, kind: input, shape index: {}]   ;;  %s1463_s6 = inlined_call_operand.hbm [shape: bf16[512,128], index: 6, kind: input, shape index: {}]   ;;  %s1464_s7 = inlined_call_operand.vmem [shape: f32[1,128], index: 7, kind: input, shape index: {}]   ;;  %s1465_s8 = inlined_call_operand.hbm [shape: bf16[128,128], index: 8, kind: input, shape index: {}]   ;;  %s1466_s9 = inlined_call_operand.vmem [shape: f32[1,128], index: 9, kind: input, shape index: {}]   ;;  %s1467_s10 = inlined_call_operand.hbm [shape: bf16[128,128], index: 10, kind: input, shape index: {}]   ;;  %s1468_s11 = inlined_call_operand.<no memory space> [shape: f32[1,1], index: 11, kind: input, shape index: {}]   ;;  %s1469_s12 = inlined_call_operand.vmem [shape: f32[8,1], index: 12, kind: output, shape index: {}]  }
   0x1   :  { %v17_v0 = vstv %s1468_s11 }
   0x2   :  { %18 = vst [vmem:[#allocation2] sm:$0x1] %v17_v0 }
   0x3   :  { %19 = vsyncpa [#allocation4], 0 }
   0x4   :  { %20 = vsyncpa [#allocation6], 0 }
   0x5   :  { %21 = vsyncpa [#allocation9], 0  ;;  %s45_s25 = sshll.u32 %s1460_s3, 4  ;;  %s46_s25 = int_to_ptr.hbm [resolvable:$true] %s45_s25 }
   0x6   :  { %22 = vsyncpa [#allocation12], 0  ;;  %s1310_s26 = smov [#allocation5]   ;;  %s68_s30 = sshll.u32 %s1463_s6, 4  ;;  %s69_s30 = int_to_ptr.hbm [resolvable:$true] %s68_s30 }
   0x7   :  { %s47_s27 = sshll.u32 %s1310_s26, 4  ;;  %s1311_s11 = smov [#allocation8]   ;;  %s48_s27 = int_to_ptr.vmem [resolvable:$true] %s47_s27 }
   0x8   :  { %50 = dma.hbm_to_vmem [thread:$0]  %s46_s25, 64, %s48_s27, [#allocation6]  }
   0x9   :  { %s70_s13 = sshll.u32 %s1311_s11, 4  ;;  %s1312_s14 = smov 64   ;;  %s71_s13 = int_to_ptr.vmem [resolvable:$true] %s70_s13 }
   0xa   :  { %s1313_s15 = smov 4   ;;  %s31_s17 = sshll.u32 %s1459_s2, 4  ;;  %s32_s17 = int_to_ptr.hbm [resolvable:$true] %s31_s17 }
   0xb   :  { %76 = dma.hbm_to_vmem [thread:$0]  %s69_s30, 4096, %s71_s13, [#allocation9], %s1312_s14, %s1312_s14, %s1313_s15  }
   0xc   :  { %s1314_s18 = smov [#allocation3]   ;;  %s58_s21 = sshll.u32 %s1462_s5, 4  ;;  %s59_s21 = int_to_ptr.hbm [resolvable:$true] %s58_s21 }
   0xd   :  { %s33_s19 = sshll.u32 %s1314_s18, 4  ;;  %s1315_s22 = smov 256   ;;  %s34_s19 = int_to_ptr.vmem [resolvable:$true] %s33_s19 }
   0xe   :  { %s1316_s23 = smov 16   ;;  %s1317_s24 = smov [#allocation7]  }
   0xf   :  { %39 = dma.hbm_to_vmem [thread:$0]  %s32_s17, 1024, %s34_s19, [#allocation4], %s1315_s22, %s1315_s22, %s1316_s23  }
  0x10   :  { %s60_s25 = sshll.u32 %s1317_s24, 4  ;;  %s83_s28 = sshll.u32 %s1465_s8, 4  ;;  %s61_s25 = int_to_ptr.vmem [resolvable:$true] %s60_s25  ;;  %s84_s28 = int_to_ptr.hbm [resolvable:$true] %s83_s28 }
  0x11   :  { %63 = dma.hbm_to_vmem [thread:$0]  %s59_s21, 64, %s61_s25, [#allocation6]  }
  0x12   :  { %s98_s30 = sshll.u32 %s1467_s10, 4  ;;  %s1318_s11 = smov [#allocation10]   ;;  %s99_s30 = int_to_ptr.hbm [resolvable:$true] %s98_s30 }
  0x13   :  { %s85_s13 = sshll.u32 %s1318_s11, 4  ;;  %s1319_s5 = smov [#allocation11]   ;;  %s86_s13 = int_to_ptr.vmem [resolvable:$true] %s85_s13 }
  0x14   :  { %91 = dma.hbm_to_vmem [thread:$0]  %s84_s28, 1024, %s86_s13, [#allocation9], %s1312_s14, %s1312_s14, %s1313_s15  }
  0x15   :  { %s100_s3 = sshll.u32 %s1319_s5, 4  ;;  %s101_s3 = int_to_ptr.vmem [resolvable:$true] %s100_s3 }
  0x16   :  { %106 = dma.hbm_to_vmem [thread:$0]  %s99_s30, 1024, %s101_s3, [#allocation12], %s1312_s14, %s1312_s14, %s1313_s15  }
  0x17   :  { %1302 = dma.done.wait [#allocation4], 1024  }
  0x18   :  { %1303 = vsyncadd [#allocation4], 4294966272 }
  0x19   :  { %1304 = dma.done.wait [#allocation6], 128  }
  0x1a   :  { %1305 = vsyncadd [#allocation6], 4294967168 }
  0x1b   :  { %1306 = dma.done.wait [#allocation9], 5120  }
  0x1c   :  { %1307 = vsyncadd [#allocation9], 4294962176 }
  0x1d   :  { %1308 = dma.done.wait [#allocation12], 1024  }
  0x1e   :  { %1309 = vsyncadd [#allocation12], 4294966272  ;;  %v875_v1 = vld [vmem:[#allocation3 + $0x20] sm:$0xf]  ;;  %v1095_v2 = vld [vmem:[#allocation3 + $0x2c] sm:$0xf0] }
  0x1f   :  { %v1093_v3 = vld [vmem:[#allocation3 + $0x24] sm:$0xf]  ;;  %v876_v4 = vor.u32 %v1095_v2, %v875_v1  ;;  %v877_v5 = vld [vmem:[#allocation3 + $0x30] sm:$0xf0]  ;;  %v859_v6 = vld [vmem:[#allocation3] sm:$0xf] }
  0x20   :  { %v1091_v7 = vld [vmem:[#allocation3 + $0xc] sm:$0xf0]  ;;  %v880_v8 = vor.u32 %v1093_v3, %v877_v5  ;;  %v1089_v9 = vld [vmem:[#allocation3 + $0x4] sm:$0xf]  ;;  %v861_v10 = vld [vmem:[#allocation3 + $0x10] sm:$0xf0] }
  0x21   :  { %v134_v11 = vld [vmem:[%s1457_s0] sm:$0xff]  ;;  %207 = vmatpush.bf16.msra.mxu2 %v876_v4  ;;  %v860_v12 = vor.u32 %v1091_v7, %v859_v6  ;;  %v883_v13 = vld [vmem:[#allocation3 + $0x28] sm:$0xf]  ;;  %v1094_v15 = vld [vmem:[#allocation3 + $0x2c] sm:$0xf]  ;;  %v864_v16 = vor.u32 %v1089_v9, %v861_v10  ;;  %vm197_vm0 = vcmask 261120  }
  0x22   :  { %v1096_v14 = vld [vmem:[#allocation3 + $0x34] sm:$0xf0]  ;;  %220 = vmatpush.bf16.msra.mxu3 %v880_v8  ;;  %v885_v18 = vld [vmem:[#allocation3 + $0x38] sm:$0xf0]  ;;  %v867_v21 = vld [vmem:[#allocation3 + $0x8] sm:$0xf]  ;;  %v135_v23 = vpack.c.bf16 %v134_v11, %v134_v11 }
  0x23   :  { %v884_v17 = vor.u32 %v1096_v14, %v883_v13  ;;  %v146_v19 = vld [vmem:[%s1461_s4] sm:$0xff]  ;;  %v888_v20 = vor.u32 %v1094_v15, %v885_v18  ;;  %v1090_v24 = vld [vmem:[#allocation3 + $0xc] sm:$0xf]  ;;  %vm281_vm1 = vcmask 1041408   ;;  %v1104_v29 = vld [vmem:[#allocation8 + $0x38] sm:$0xff]  ;;  %vm277_vm2 = vcmask 31744  }
  0x24   :  { %272 = vst [vmem:[#allocation1] ss:$4 sm:$0xff] %v146_v19  ;;  %v1092_v22 = vld [vmem:[#allocation3 + $0x14] sm:$0xf0]  ;;  %v869_v25 = vld [vmem:[#allocation3 + $0x18] sm:$0xf0] }
  0x25   :  { %208 = vmatpush.bf16.msra.mxu2 %v860_v12  ;;  %v868_v26 = vor.u32 %v1092_v22, %v867_v21  ;;  %v872_v27 = vor.u32 %v1090_v24, %v869_v25  ;;  %v136_v28 = vld [vmem:[%s1458_s1] sm:$0xff]  ;;  %v1112_v30 = vld [vmem:[#allocation8 + $0x78] sm:$0xff]  ;;  %v1101_v44 = vld [vmem:[#allocation8 + $0x20] sm:$0xff]  ;;  %vm847_vm3 = vcmask 7168  }
  0x26   :  { %221 = vmatpush.bf16.msra.mxu3 %v864_v16  ;;  %v137_v35 = vpack.c.bf16 %v136_v28, %v136_v28  ;;  %v1103_v40 = vld [vmem:[#allocation8 + $0x30] sm:$0xff]  ;;  %v1102_v42 = vld [vmem:[#allocation8 + $0x28] sm:$0xff]  ;;  %v1109_v45 = vld [vmem:[#allocation8 + $0x60] sm:$0xff] }
  0x27   :  { %v1111_v41 = vld [vmem:[#allocation8 + $0x70] sm:$0xff]  ;;  %v1110_v43 = vld [vmem:[#allocation8 + $0x68] sm:$0xff]  ;;  %v1100_v46 = vld [vmem:[#allocation8 + $0x18] sm:$0xff] }
  0x28   :  { %889 = vmatmul.msk.bf16.vlgmr.msra.gmra.mxu2 %vm197_vm0, %v135_v23  ;;  %v1108_v47 = vld [vmem:[#allocation8 + $0x58] sm:$0xff]  ;;  %v1099_v48 = vld [vmem:[#allocation8 + $0x10] sm:$0xff]  ;;  %v1098_v50 = vld [vmem:[#allocation8 + $0x8] sm:$0xff] }
  0x29   :  { %233 = vmatpush.bf16.msrb.mxu2 %v884_v17  ;;  %890 = vmatmul.msk.bf16.vlgmr.msra.gmra.mxu3 %vm197_vm0, %v135_v23  ;;  %v1107_v49 = vld [vmem:[#allocation8 + $0x50] sm:$0xff]  ;;  %v1106_v51 = vld [vmem:[#allocation8 + $0x48] sm:$0xff]  ;;  %v1097_v52 = vld [vmem:[#allocation8] sm:$0xff] }
  0x2a   :  { %246 = vmatpush.bf16.msrb.mxu3 %v888_v20  ;;  %v1105_v53 = vld [vmem:[#allocation8 + $0x40] sm:$0xff]  ;;  %v1120_v54 = vld [vmem:[#allocation8 + $0xb8] sm:$0xff]  ;;  %v1119_v56 = vld [vmem:[#allocation8 + $0xb0] sm:$0xff] }
  0x2b   :  { %v273_v31 = vld.sshfl [vmem:[#allocation1] sm:$0xff pattern:$0x73625140]  ;;  %v274_v32 = vld.sshfl [vmem:[#allocation1 + $0x8] sm:$0xff pattern:$0x73625140] }
  0x2c   :  { %v282_v33 = vsel %vm281_vm1, %v273_v31, 0  ;;  %v284_v34 = vsel %vm281_vm1, %v274_v32, 0  ;;  %v275_v36 = vld.sshfl [vmem:[#allocation1 + $0x10] sm:$0xff pattern:$0x73625140]  ;;  %v1127_v57 = vld [vmem:[#allocation8 + $0xf0] sm:$0xff] }
  0x2d   :  { %234 = vmatpush.bf16.msrb.mxu2 %v868_v26  ;;  %297 = vmatpush.bf16.msra.mxu0 %v282_v33  ;;  %v286_v37 = vsel %vm281_vm1, %v275_v36, 0  ;;  %v276_v38 = vld.sshfl [vmem:[#allocation1 + $0x18] sm:$0xff pattern:$0x73625140]  ;;  %v1128_v55 = vld [vmem:[#allocation8 + $0xf8] sm:$0xff]  ;;  %v1115_v17 = vld [vmem:[#allocation8 + $0x90] sm:$0xff] }
  0x2e   :  { %247 = vmatpush.bf16.msrb.mxu3 %v872_v27  ;;  %310 = vmatpush.bf16.msra.mxu1 %v284_v34  ;;  %v288_v39 = vsel %vm281_vm1, %v276_v38, 0  ;;  %v1118_v58 = vld [vmem:[#allocation8 + $0xa8] sm:$0xff]  ;;  %v1436_v60 = vld [vmem:[#allocation5] sm:$0xf]  ;;  %v1117_v61 = vld [vmem:[#allocation8 + $0xa0] sm:$0xff] }
  0x2f   :  { %v1126_v59 = vld [vmem:[#allocation8 + $0xe8] sm:$0xff]  ;;  %v1125_v62 = vld [vmem:[#allocation8 + $0xe0] sm:$0xff]  ;;  %v1438_v63 = vld [vmem:[#allocation7] sm:$0xf]  ;;  %v149_v0 = vperm.slane %v1436_v60, 0  ;;  %v150_v1 = vperm.slane %v1436_v60, 1 }
  0x30   :  { %893 = vmatmul.msk.bf16.vlgmr.msra.gmra.mxu0 %vm277_vm2, %v137_v35  ;;  %v263_v2 = vperm.slane %v1438_v63, 0  ;;  %v264_v3 = vperm.slane %v1438_v63, 1  ;;  %v1116_v5 = vld [vmem:[#allocation8 + $0x98] sm:$0xff]  ;;  %v1123_v18 = vld [vmem:[#allocation8 + $0xd0] sm:$0xff]  ;;  %v1114_v26 = vld [vmem:[#allocation8 + $0x88] sm:$0xff] }
  0x31   :  { %323 = vmatpush.bf16.msra.mxu2 %v286_v37  ;;  %626 = vmatpush.bf16.msrb.mxu0 %v1104_v29  ;;  %v1124_v6 = vld [vmem:[#allocation8 + $0xd8] sm:$0xff]  ;;  %v1122_v27 = vld [vmem:[#allocation8 + $0xc8] sm:$0xff]  ;;  %v1121_v36 = vld [vmem:[#allocation8 + $0xc0] sm:$0xff] }
  0x32   :  { %336 = vmatpush.bf16.msra.mxu3 %v288_v39  ;;  %639 = vmatpush.bf16.msrb.mxu1 %v1112_v30 }
  0x33   :  { %894 = vmatmul.msk.bf16.vlgmr.msra.gmra.mxu1 %vm277_vm2, %v137_v35 }
  0x35   :  { %627 = vmatpush.bf16.msrb.mxu0 %v1103_v40 }
  0x36   :  { %640 = vmatpush.bf16.msrb.mxu1 %v1111_v41 }
  0x38   :  { %891 = vmatmul.msk.bf16.vlgmr.msrb.gmra.mxu2 %vm197_vm0, %v135_v23 }
  0x39   :  { %628 = vmatpush.bf16.msrb.mxu0 %v1102_v42  ;;  %892 = vmatmul.msk.bf16.vlgmr.msrb.gmra.mxu3 %vm197_vm0, %v135_v23 }
  0x3a   :  { %641 = vmatpush.bf16.msrb.mxu1 %v1110_v43  ;;  %652 = vmatpush.bf16.msrb.mxu2 %v1120_v54  ;;  %v151_v43 = vperm.slane %v1436_v60, 2 }
  0x3b   :  { %665 = vmatpush.bf16.msrb.mxu3 %v1128_v55 }
  0x3d   :  { %629 = vmatpush.bf16.msrb.mxu0 %v1101_v44 }
  0x3e   :  { %642 = vmatpush.bf16.msrb.mxu1 %v1109_v45  ;;  %653 = vmatpush.bf16.msrb.mxu2 %v1119_v56  ;;  %v152_v45 = vperm.slane %v1436_v60, 3 }
  0x3f   :  { %666 = vmatpush.bf16.msrb.mxu3 %v1127_v57 }
  0x41   :  { %630 = vmatpush.bf16.msrb.mxu0 %v1100_v46 }
  0x42   :  { %643 = vmatpush.bf16.msrb.mxu1 %v1108_v47  ;;  %654 = vmatpush.bf16.msrb.mxu2 %v1118_v58  ;;  %v265_v47 = vperm.slane %v1438_v63, 2 }
  0x43   :  { %667 = vmatpush.bf16.msrb.mxu3 %v1126_v59 }
  0x45   :  { %631 = vmatpush.bf16.msrb.mxu0 %v1099_v48 }
  0x46   :  { %644 = vmatpush.bf16.msrb.mxu1 %v1107_v49  ;;  %655 = vmatpush.bf16.msrb.mxu2 %v1117_v61  ;;  %v266_v49 = vperm.slane %v1438_v63, 3 }
  0x47   :  { %668 = vmatpush.bf16.msrb.mxu3 %v1125_v62 }
  0x48   :  { %895 = vmatmul.msk.bf16.vlgmr.msra.gmra.mxu2 %vm277_vm2, %v137_v35 }
  0x49   :  { %896 = vmatmul.msk.bf16.vlgmr.msra.gmra.mxu3 %vm277_vm2, %v137_v35  ;;  %632 = vmatpush.bf16.msrb.mxu0 %v1098_v50  ;;  %v1113_v35 = vld [vmem:[#allocation8 + $0x80] sm:$0xff] }
  0x4a   :  { %645 = vmatpush.bf16.msrb.mxu1 %v1106_v51  ;;  %656 = vmatpush.bf16.msrb.mxu2 %v1116_v5 }
  0x4b   :  { %669 = vmatpush.bf16.msrb.mxu3 %v1124_v6 }
  0x4d   :  { %633 = vmatpush.bf16.msrb.mxu0 %v1097_v52 }
  0x4e   :  { %646 = vmatpush.bf16.msrb.mxu1 %v1105_v53  ;;  %657 = vmatpush.bf16.msrb.mxu2 %v1115_v17 }
  0x4f   :  { %670 = vmatpush.bf16.msrb.mxu3 %v1123_v18  ;;  %v1130_v18 = vld [vmem:[#allocation10 + $0x8] sm:$0xff] }
  0x52   :  { %658 = vmatpush.bf16.msrb.mxu2 %v1114_v26 }
  0x53   :  { %671 = vmatpush.bf16.msrb.mxu3 %v1122_v27  ;;  %v1139_v27 = vld [vmem:[#allocation11 + $0x10] sm:$0xff] }
  0x56   :  { %659 = vmatpush.bf16.msrb.mxu2 %v1113_v35 }
  0x57   :  { %672 = vmatpush.bf16.msrb.mxu3 %v1121_v36 }
  0xab   :  { %v210_v4 = vpop.f32.mrf.mxu2 }
  0xac   :  { %v211_v7 = vadd.f32 %v210_v4, %v149_v0  ;;  %v223_v8 = vpop.f32.mrf.mxu3 }
  0xad   :  { %v299_v9 = vpop.f32.mrf.mxu0  ;;  %v224_v10 = vadd.f32 %v223_v8, %v150_v1  ;;  %v1136_v8 = vld [vmem:[#allocation10 + $0x38] sm:$0xff] }
  0xae   :  { %v300_v11 = vadd.f32 %v299_v9, %v263_v2  ;;  %v253_v13 = vmul.f32 0.2, %v211_v7  ;;  %749 = vmatpush.bf16.msra.mxu0 %v1136_v8  ;;  %v1135_v9 = vld [vmem:[#allocation10 + $0x30] sm:$0xff] }
  0xaf   :  { %v254_v15 = vmul.f32 0.2, %v224_v10 }
  0xb0   :  { %v312_v12 = vpop.f32.mrf.mxu1  ;;  %v342_v16 = vmul.f32 0.2, %v300_v11  ;;  %v257_v19 = vmax.f32 %v211_v7, %v253_v13 }
  0xb1   :  { %v313_v14 = vadd.f32 %v312_v12, %v264_v3  ;;  %v258_v21 = vmax.f32 %v224_v10, %v254_v15  ;;  %v1134_v10 = vld [vmem:[#allocation10 + $0x28] sm:$0xff]  ;;  %v1132_v12 = vld [vmem:[#allocation10 + $0x18] sm:$0xff]  ;;  %v1131_v15 = vld [vmem:[#allocation10 + $0x10] sm:$0xff] }
  0xb2   :  { %v346_v22 = vmax.f32 %v300_v11, %v342_v16  ;;  %750 = vmatpush.bf16.msra.mxu0 %v1135_v9  ;;  %v1133_v11 = vld [vmem:[#allocation10 + $0x20] sm:$0xff] }
  0xb3   :  { %v343_v20 = vmul.f32 0.2, %v313_v14  ;;  %v212_v25 = vpop.f32.mrf.mxu2 }
  0xb4   :  { %v350_v24 = vadd.f32 %v346_v22, %v257_v19  ;;  %v225_v29 = vpop.f32.mrf.mxu3  ;;  %v1129_v19 = vld [vmem:[#allocation10] sm:$0xff]  ;;  %v1142_v22 = vld [vmem:[#allocation11 + $0x28] sm:$0xff]  ;;  %v1140_v25 = vld [vmem:[#allocation11 + $0x18] sm:$0xff] }
  0xb5   :  { %v347_v23 = vmax.f32 %v313_v14, %v343_v20  ;;  %v301_v30 = vpop.f32.mrf.mxu0  ;;  %v1144_v20 = vld [vmem:[#allocation11 + $0x38] sm:$0xff] }
  0xb6   :  { %v354_v31 = vmul.f32 0.2, %v350_v24  ;;  %751 = vmatpush.bf16.msra.mxu0 %v1134_v10  ;;  %829 = vmatpush.bf16.msra.mxu1 %v1144_v20 }
  0xb7   :  { %v351_v28 = vadd.f32 %v347_v23, %v258_v21  ;;  %v1143_v21 = vld [vmem:[#allocation11 + $0x30] sm:$0xff]  ;;  %v1141_v23 = vld [vmem:[#allocation11 + $0x20] sm:$0xff] }
  0xb8   :  { %v314_v32 = vpop.f32.mrf.mxu1  ;;  %v358_v34 = vmax.f32 %v350_v24, %v354_v31  ;;  %v1155_v24 = vld [vmem:[%s1464_s7] ss:$0 sm:$0xff] }
  0xb9   :  { %v355_v33 = vmul.f32 0.2, %v351_v28 }
  0xba   :  { %v362_v38 = vpack.c.bf16 %v358_v34, %v358_v34  ;;  %752 = vmatpush.bf16.msra.mxu0 %v1133_v11  ;;  %830 = vmatpush.bf16.msra.mxu1 %v1143_v21 }
  0xbb   :  { %v359_v37 = vmax.f32 %v351_v28, %v355_v33  ;;  %v236_v40 = vpop.f32.mrf.mxu2 }
  0xbc   :  { %634 = vmatmul.bf16.vlgmr.msrb.gmra.mxu0 %v362_v38  ;;  %v249_v41 = vpop.f32.mrf.mxu3  ;;  %v237_v46 = vadd.f32 %v236_v40, %v151_v43  ;;  %v1138_v38 = vld [vmem:[#allocation11 + $0x8] sm:$0xff] }
  0xbd   :  { %v363_v39 = vpack.c.bf16 %v359_v37, %v359_v37  ;;  %v250_v48 = vadd.f32 %v249_v41, %v152_v45  ;;  %v1156_v40 = vld [vmem:[%s1466_s9] ss:$0 sm:$0xff] }
  0xbe   :  { %v255_v51 = vmul.f32 0.2, %v237_v46  ;;  %753 = vmatpush.bf16.msra.mxu0 %v1132_v12  ;;  %831 = vmatpush.bf16.msra.mxu1 %v1142_v22 }
  0xbf   :  { %647 = vmatmul.bf16.vlgmr.msrb.gmra.mxu1 %v363_v39  ;;  %v256_v54 = vmul.f32 0.2, %v250_v48  ;;  %v1137_v39 = vld [vmem:[#allocation11] sm:$0xff] }
  0xc0   :  { %v259_v58 = vmax.f32 %v237_v46, %v255_v51 }
  0xc1   :  { %v260_v61 = vmax.f32 %v250_v48, %v256_v54 }
  0xc2   :  { %754 = vmatpush.bf16.msra.mxu0 %v1131_v15  ;;  %832 = vmatpush.bf16.msra.mxu1 %v1141_v23 }
  0xc3   :  { %v238_v42 = vpop.f32.mrf.mxu2 }
  0xc4   :  { %v251_v44 = vpop.f32.mrf.mxu3 }
  0xc6   :  { %755 = vmatpush.bf16.msra.mxu0 %v1130_v18  ;;  %833 = vmatpush.bf16.msra.mxu1 %v1140_v25 }
  0xca   :  { %756 = vmatpush.bf16.msra.mxu0 %v1129_v19  ;;  %834 = vmatpush.bf16.msra.mxu1 %v1139_v27 }
  0xcb   :  { %v325_v50 = vpop.f32.mrf.mxu2 }
  0xcc   :  { %v326_v52 = vadd.f32 %v325_v50, %v265_v47  ;;  %v338_v53 = vpop.f32.mrf.mxu3  ;;  %v1157_v47 = vld [vmem:[#allocation2] ss:$0 sm:$0xff] }
  0xcd   :  { %v339_v55 = vadd.f32 %v338_v53, %v266_v49 }
  0xce   :  { %v344_v56 = vmul.f32 0.2, %v326_v52  ;;  %835 = vmatpush.bf16.msra.mxu1 %v1138_v38 }
  0xcf   :  { %v345_v57 = vmul.f32 0.2, %v339_v55 }
  0xd0   :  { %v348_v59 = vmax.f32 %v326_v52, %v344_v56 }
  0xd1   :  { %v349_v62 = vmax.f32 %v339_v55, %v345_v57 }
  0xd2   :  { %v352_v0 = vadd.f32 %v348_v59, %v259_v58  ;;  %836 = vmatpush.bf16.msra.mxu1 %v1137_v39 }
  0xd3   :  { %v353_v60 = vadd.f32 %v349_v62, %v260_v61  ;;  %v327_v1 = vpop.f32.mrf.mxu2 }
  0xd4   :  { %v356_v2 = vmul.f32 0.2, %v352_v0  ;;  %v340_v3 = vpop.f32.mrf.mxu3 }
  0xd5   :  { %v357_v4 = vmul.f32 0.2, %v353_v60 }
  0xd6   :  { %v360_v5 = vmax.f32 %v352_v0, %v356_v2 }
  0xd7   :  { %v361_v63 = vmax.f32 %v353_v60, %v357_v4 }
  0xd8   :  { %v364_v6 = vpack.c.bf16 %v360_v5, %v360_v5 }
  0xd9   :  { %v365_v7 = vpack.c.bf16 %v361_v63, %v361_v63 }
  0xda   :  { %660 = vmatmul.bf16.vlgmr.msrb.gmra.mxu2 %v364_v6 }
  0xdb   :  { %673 = vmatmul.bf16.vlgmr.msrb.gmra.mxu3 %v365_v7 }
 0x139   :  { %v635_v13 = vpop.f32.mrf.mxu0 }
 0x13a   :  { %v636_v26 = vadd.f32 %v1155_v24, %v635_v13 }
 0x13c   :  { %v648_v14 = vpop.f32.mrf.mxu1 }
 0x13d   :  { %v649_v28 = vadd.f32 %v648_v14, %v636_v26 }
 0x141   :  { %v637_v16 = vpop.f32.mrf.mxu0 }
 0x144   :  { %v650_v17 = vpop.f32.mrf.mxu1 }
 0x15d   :  { %v661_v29 = vpop.f32.mrf.mxu2 }
 0x15e   :  { %v662_v30 = vadd.f32 %v661_v29, %v649_v28  ;;  %v674_v31 = vpop.f32.mrf.mxu3 }
 0x160   :  { %v675_v32 = vadd.f32 %v674_v31, %v662_v30 }
 0x162   :  { %v678_v33 = vmul.f32 0.2, %v675_v32 }
 0x164   :  { %v679_v34 = vmax.f32 %v675_v32, %v678_v33 }
 0x165   :  { %v663_v35 = vpop.f32.mrf.mxu2 }
 0x166   :  { %v680_v36 = vpack.c.bf16 %v679_v34, %v679_v34  ;;  %v676_v37 = vpop.f32.mrf.mxu3 }
 0x168   :  { %757 = vmatmul.bf16.vlgmr.msra.gmra.mxu0 %v680_v36 }
 0x1e5   :  { %v758_v41 = vpop.f32.mrf.mxu0 }
 0x1e6   :  { %v759_v42 = vadd.f32 %v1156_v40, %v758_v41 }
 0x1e8   :  { %v762_v43 = vmul.f32 0.2, %v759_v42 }
 0x1ea   :  { %v763_v44 = vmax.f32 %v759_v42, %v762_v43 }
 0x1ec   :  { %v764_v45 = vpack.c.bf16 %v763_v44, %v763_v44 }
 0x1ed   :  { %v760_v46 = vpop.f32.mrf.mxu0 }
 0x1ee   :  { %837 = vmatmul.bf16.vlgmr.msra.gmra.mxu1 %v764_v45 }
 0x26b   :  { %v838_v48 = vpop.f32.mrf.mxu1 }
 0x26c   :  { %v846_v49 = vadd.f32 %v1157_v47, %v838_v48 }
 0x26e   :  { %848 = vst.msk [vmem:[%s1469_s12] sm:$0xff] %vm847_vm3, %v846_v49 }
 0x273   :  { %v840_v50 = vpop.f32.mrf.mxu1 }
 0x274   :  { %853 = vsyncpa [#allocation4], 1 }
 0x275   :  { %854 = vsyncpa [#allocation6], 1 }
 0x276   :  { %855 = vsyncpa [#allocation9], 1 }
 0x277   :  { %856 = vsyncpa [#allocation12], 1 }

</bundles_post_ra>
